<compile_context>
chip_gen: v5e
topology: v5e:2x2
jax: 0.10.0
libtpu: 0.0.40
codegen_flags: <defaults>
</compile_context>

<pallas_src>
import functools

import jax
import jax.numpy as jnp
import numpy as np
from jax.experimental import pallas as pl
from jax.experimental.pallas import tpu as pltpu


# ----------------------------------------------------------------------------
# Device-generation heuristics (safe fallbacks if the query fails).
# ----------------------------------------------------------------------------
def _device_kind():
    try:
        return jax.devices()[0].device_kind.lower()
    except Exception:
        return ""


def _vmem_cap_bytes():
    kind = _device_kind()
    if "v7" in kind:
        return 48 * 1024 * 1024      # v7x: 64 MiB physical VMEM per TensorCore
    return 96 * 1024 * 1024          # v5e / v6e: 128 MiB physical


def _softmax_exp_dtype():
    kind = _device_kind()
    if ("v6" in kind) or ("v7" in kind):
        return jnp.bfloat16          # bf16 EUP on v6e / v7x (~2x exp rate)
    return jnp.float32               # v5e and older: keep the exp in f32


# ----------------------------------------------------------------------------
# Per-batch XLA prologue: phi/g 1x1 convs + 2x2 max-pool (+ optional theta fold)
# ----------------------------------------------------------------------------
def _pooled_prologue(x_bcn, w_theta, w_phi, w_g, H, W, fold_theta):
    """Returns (key, g_p): key is A=(B,C,M) if fold_theta else phi_p=(B,C//8,M);
    g_p is (B, C//2, M).  All bf16, channel-first (M on the lane axis)."""
    B, C, N = x_bcn.shape
    assert N == H * W
    C8, C2 = C // 8, C // 2
    C58 = C8 + C2
    M = (H // 2) * (W // 2)
    bf, f32 = jnp.bfloat16, jnp.float32

    wpg = jnp.concatenate([w_phi, w_g], axis=0).astype(bf)              # (C58, C)
    pg = jnp.einsum('oc,bcn->bon', wpg, x_bcn.astype(bf),
                    preferred_element_type=f32)                         # (B, C58, N)
    # 2x2 max pool on the (H, W) grid (n = h*W + w).
    pg = pg.reshape(B, C58, H // 2, 2, W // 2, 2)
    pooled = pg.max(axis=(3, 5)).reshape(B, C58, M)                     # (B, C58, M)
    phi_p = pooled[:, :C8, :]                                           # (B, C8, M) f32
    g_p = pooled[:, C8:, :].astype(bf)                                  # (B, C2, M)

    if fold_theta:
        # Fold the theta 1x1 conv into the score matmul:
        # A[c, m] = sum_k W_theta[k, c] * phi_p[k, m]  ->  s = x^T @ A (K = C).
        key = jnp.einsum('kc,bkm->bcm', w_theta.astype(f32), phi_p,
                         preferred_element_type=f32).astype(bf)         # (B, C, M)
    else:
        key = phi_p.astype(bf)                                          # (B, C8, M)
    return key, g_p


# ----------------------------------------------------------------------------
# Main Pallas kernel: per query tile (scores -> softmax -> attend -> o conv
# -> residual), fully fused, no HBM (N, M) attention matrix.
# ----------------------------------------------------------------------------
def _attn_kernel(*refs, fold_theta, exp_dtype):
    if fold_theta:
        x_ref, key_ref, g_ref, wo_ref, gamma_ref, o_ref = refs
        wth_ref = None
    else:
        x_ref, wth_ref, key_ref, g_ref, wo_ref, gamma_ref, o_ref = refs

    f32, bf = jnp.float32, jnp.bfloat16

    x_t = x_ref[0]                                    # (C, TILE_N), channel-first
    x_b = x_t.astype(bf)

    if fold_theta:
        q = x_b                                       # (C, TILE_N); key = A (C, M)
    else:
        # theta 1x1 conv, channel-first: (C//8, TILE_N)
        q = jnp.dot(wth_ref[...], x_b, preferred_element_type=f32).astype(bf)

    # scores (TILE_N, M): contract the channel dim of q and key (both dim 0).
    s = jax.lax.dot_general(q, key_ref[0],
                            (((0,), (0,)), ((), ())),
                            preferred_element_type=f32)
    s = s - jnp.max(s, axis=-1, keepdims=True)
    e = jnp.exp(s.astype(exp_dtype))                  # bf16 exp on v6e/v7x
    denom = jnp.sum(e.astype(f32), axis=-1, keepdims=True)
    beta = (e.astype(f32) * pl.reciprocal(denom, approx=True)).astype(bf)

    # attn (C//2, TILE_N) = g_p @ beta^T  (contract M = last dim of both).
    attn = jax.lax.dot_general(g_ref[0], beta,
                               (((1,), (1,)), ((), ())),
                               preferred_element_type=f32)
    # output 1x1 conv (C, TILE_N)
    o = jnp.dot(wo_ref[...], attn.astype(bf), preferred_element_type=f32)

    gamma = gamma_ref[0, 0]
    o_ref[0] = (gamma * o + x_t.astype(f32)).astype(o_ref.dtype)


# ----------------------------------------------------------------------------
# Wrapper
# ----------------------------------------------------------------------------
def attention_forward(x_nchw, w_theta, w_phi, w_g, w_o, gamma, *,
                      tile_n=None, fold_theta=None,
                      input_dtype=jnp.bfloat16, out_dtype=None):
    """x_nchw: (B, C, H, W).  Weights are PyTorch-layout (out_c, in_c)."""
    B, C, H, W = x_nchw.shape
    assert C % 8 == 0 and H % 2 == 0 and W % 2 == 0
    N = H * W
    M = (H // 2) * (W // 2)
    C8, C2 = C // 8, C // 2

    if fold_theta is None:
        fold_theta = C <= 128            # per review: fold only when K<=128
    Ck = C if fold_theta else C8
    if out_dtype is None:
        out_dtype = x_nchw.dtype
    exp_dtype = _softmax_exp_dtype()

    # Channel-first, spatially flattened view of x: zero-copy from NCHW.
    x = x_nchw.reshape(B, C, N)
    key, g_p = _pooled_prologue(x, w_theta, w_phi, w_g, H, W, fold_theta)
    x_in = x.astype(input_dtype)
    wth = w_theta.astype(jnp.bfloat16)                                  # (C/8, C)
    wo = w_o.astype(jnp.bfloat16)                                       # (C, C/2)
    gamma_arr = jnp.asarray(gamma, jnp.float32).reshape(1, 1)

    # --- tile / VMEM budgeting (generation & shape aware) --------------------
    x_isz = jnp.dtype(input_dtype).itemsize
    o_isz = jnp.dtype(out_dtype).itemsize
    cap = _vmem_cap_bytes()

    def vmem_estimate(t):
        ins = 2 * (C * t * x_isz + Ck * M * 2 + C2 * M * 2
                   + C * C2 * 2 + C8 * C * 2)          # double-buffered inputs
        outs = 2 * C * t * o_isz                        # double-buffered output
        temps = 3 * t * M * 4 + 3 * C * t * 4           # softmax + conv temps
        return ins + outs + temps

    if tile_n is None:
        cands = sorted({t for t in (1024, 512, 256, 128) if N % t == 0} | {N},
                       reverse=True)
        budget = int(0.75 * cap)
        tile_n = next((t for t in cands if vmem_estimate(t) <= budget), cands[-1])
    assert N % tile_n == 0 and (tile_n % 128 == 0 or tile_n == N)
    nt = N // tile_n

    vmem_limit = min(cap, max(16 * 1024 * 1024,
                              int(1.3 * vmem_estimate(tile_n)) + (8 << 20)))

    kernel = functools.partial(_attn_kernel, fold_theta=fold_theta,
                               exp_dtype=exp_dtype)

    in_specs = [pl.BlockSpec((1, C, tile_n), lambda b, n: (b, 0, n))]   # x tile
    args = [x_in]
    if not fold_theta:
        in_specs.append(pl.BlockSpec((C8, C), lambda b, n: (0, 0)))     # W_theta
        args.append(wth)
    in_specs += [
        pl.BlockSpec((1, Ck, M), lambda b, n: (b, 0, 0)),               # key (A / phi_p)
        pl.BlockSpec((1, C2, M), lambda b, n: (b, 0, 0)),               # pooled g
        pl.BlockSpec((C, C2), lambda b, n: (0, 0)),                     # W_o
        pl.BlockSpec(memory_space=pltpu.MemorySpace.SMEM),              # gamma scalar
    ]
    args += [key, g_p, wo, gamma_arr]

    out = pl.pallas_call(
        kernel,
        out_shape=jax.ShapeDtypeStruct((B, C, N), out_dtype),
        grid=(B, nt),
        in_specs=in_specs,
        out_specs=pl.BlockSpec((1, C, tile_n), lambda b, n: (b, 0, n)),
        compiler_params=pltpu.CompilerParams(
            dimension_semantics=("parallel", "parallel"),
            vmem_limit_bytes=vmem_limit,
        ),
    )(*args)

    return out.reshape(B, C, H, W)


# ----------------------------------------------------------------------------
# References & init helpers
# ----------------------------------------------------------------------------
def _orthogonal(key, out_c, in_c):
    """Deterministic (semi-)orthogonal init, matching nn.init.orthogonal_.
    Spectral norm of a (semi-)orthogonal matrix is 1, so the spectral_norm
    wrapper in the PyTorch module is ~a no-op on these weights."""
    n = max(out_c, in_c)
    a = jax.random.normal(key, (n, n), dtype=jnp.float32)
    q, r = jnp.linalg.qr(a)
    d = jnp.diag(r)
    q = q * jnp.where(d >= 0, 1.0, -1.0)[None, :]
    return q[:out_c, :in_c]


def _reference_f32(x_nchw, w_theta, w_phi, w_g, w_o, gamma):
    """Plain-JAX, full-f32 re-implementation of the PyTorch forward."""
    B, C, H, W = x_nchw.shape
    conv = lambda t, w: jnp.einsum('oc,bchw->bohw', w, t)
    pool = lambda t: t.reshape(t.shape[0], t.shape[1], H // 2, 2, W // 2, 2).max(axis=(3, 5))
    theta = conv(x_nchw, w_theta).reshape(B, C // 8, -1)
    phi = pool(conv(x_nchw, w_phi)).reshape(B, C // 8, -1)
    g = pool(conv(x_nchw, w_g)).reshape(B, C // 2, -1)
    beta = jax.nn.softmax(jnp.einsum('bcn,bcm->bnm', theta, phi), axis=-1)
    o = jnp.einsum('bcm,bnm->bcn', g, beta).reshape(B, C // 2, H, W)
    o = conv(o, w_o)
    return gamma * o + x_nchw


def _reference_matched(x_nchw, w_theta, w_phi, w_g, w_o, gamma, *,
                       fold_theta, exp_dtype, input_dtype):
    """Plain-JAX forward with the same prologue and cast points as the kernel."""
    B, C, H, W = x_nchw.shape
    N = H * W
    bf, f32 = jnp.bfloat16, jnp.float32
    x = x_nchw.reshape(B, C, N)
    key, g_p = _pooled_prologue(x, w_theta, w_phi, w_g, H, W, fold_theta)
    x_in = x.astype(input_dtype)
    xb = x_in.astype(bf)
    if fold_theta:
        q = xb
    else:
        q = jnp.einsum('kc,bcn->bkn', w_theta.astype(bf), xb,
                       preferred_element_type=f32).astype(bf)
    s = jnp.einsum('bkn,bkm->bnm', q, key, preferred_element_type=f32)
    s = s - jnp.max(s, axis=-1, keepdims=True)
    e = jnp.exp(s.astype(exp_dtype))
    denom = jnp.sum(e.astype(f32), axis=-1, keepdims=True)
    beta = (e.astype(f32) / denom).astype(bf)
    attn = jnp.einsum('bcm,bnm->bcn', g_p, beta, preferred_element_type=f32)
    o = jnp.einsum('co,bon->bcn', w_o.astype(bf), attn.astype(bf),
                   preferred_element_type=f32)
    out = gamma * o + x_in.astype(f32)
    return out.reshape(B, C, H, W)


# ----------------------------------------------------------------------------
# Demo / self-test
# ----------------------------------------------------------------------------
if __name__ == "__main__":
    B, C, H, W = 2, 32, 16, 16            # channels must be divisible by 8
    key = jax.random.PRNGKey(0)
    kx, k1, k2, k3, k4 = jax.random.split(key, 5)

    x = jax.random.normal(kx, (B, C, H, W), dtype=jnp.float32)
    w_theta = _orthogonal(k1, C // 8, C)
    w_phi = _orthogonal(k2, C // 8, C)
    w_g = _orthogonal(k3, C // 2, C)
    w_o = _orthogonal(k4, C, C // 2)

    # Module-faithful init: gamma = 0.0 -> output is the (bf16-rounded) input.
    out0 = jax.block_until_ready(
        attention_forward(x, w_theta, w_phi, w_g, w_o, 0.0))
    assert out0.shape == x.shape
    np.testing.assert_allclose(
        np.asarray(out0),
        np.asarray(x.astype(jnp.bfloat16).astype(jnp.float32)),
        rtol=0.0, atol=1e-6)

    # gamma = 1.0 so the attention path is active; exercise both the folded
    # (C <= 128) and the general (un-folded) kernel paths.
    exp_dtype = _softmax_exp_dtype()
    for fold in (True, False):
        got = jax.block_until_ready(
            attention_forward(x, w_theta, w_phi, w_g, w_o, 1.0, fold_theta=fold))

        # Tight check vs. a reference with identical bf16 cast points.
        ref_m = _reference_matched(x, w_theta, w_phi, w_g, w_o, 1.0,
                                   fold_theta=fold, exp_dtype=exp_dtype,
                                   input_dtype=jnp.bfloat16)
        np.testing.assert_allclose(np.asarray(got), np.asarray(ref_m),
                                   rtol=2e-2, atol=2e-2)

        # Coarser check vs. the full-f32 (PyTorch-faithful) reference.
        ref_f = _reference_f32(x, w_theta, w_phi, w_g, w_o, 1.0)
        np.testing.assert_allclose(np.asarray(got), np.asarray(ref_f),
                                   rtol=5e-2, atol=5e-2)

    print("KERNEL_OK")
</pallas_src>

<mosaic_0001>
module attributes {stable_mosaic.version = 11 : i64} {
  func.func @_attn_kernel(%arg0: i32, %arg1: i32, %arg2: memref<1x32x256xbf16, #tpu.memory_space<vmem>>, %arg3: memref<1x32x64xbf16, #tpu.memory_space<vmem>>, %arg4: memref<1x16x64xbf16, #tpu.memory_space<vmem>>, %arg5: memref<32x16xbf16, #tpu.memory_space<vmem>>, %arg6: memref<1x1xf32, #tpu.memory_space<smem>>, %arg7: memref<1x32x256xf32, #tpu.memory_space<vmem>>) attributes {dimension_semantics = [#tpu.dimension_semantics<parallel>, #tpu.dimension_semantics<parallel>], iteration_bounds = array<i64: 2, 1>, scalar_prefetch = 0 : i64, scratch_operands = 0 : i64, tpu.core_type = #tpu.core_type<tc>, window_params = [{transform_indices = @transform_0, window_bounds = array<i64: 1, 32, 256>}, {transform_indices = @transform_1, window_bounds = array<i64: 1, 32, 64>}, {transform_indices = @transform_2, window_bounds = array<i64: 1, 16, 64>}, {pipeline_mode = #tpu.pipeline_mode<synchronous>, transform_indices = @transform_3, window_bounds = array<i64: 32, 16>}, {transform_indices = @transform_4, window_bounds = array<i64: 1, 1>}, {transform_indices = @transform_5, window_bounds = array<i64: 1, 32, 256>}]} {
    %c0 = arith.constant 0 : index
    %c0_0 = arith.constant 0 : index
    %c0_1 = arith.constant 0 : index
    %0 = vector.load %arg2[%c0, %c0_0, %c0_1] : memref<1x32x256xbf16, #tpu.memory_space<vmem>>, vector<1x32x256xbf16>
    %1 = vector.shape_cast %0 : vector<1x32x256xbf16> to vector<32x256xbf16>
    %c0_2 = arith.constant 0 : index
    %c0_3 = arith.constant 0 : index
    %c0_4 = arith.constant 0 : index
    %2 = vector.load %arg3[%c0_2, %c0_3, %c0_4] : memref<1x32x64xbf16, #tpu.memory_space<vmem>>, vector<1x32x64xbf16>
    %3 = vector.shape_cast %2 : vector<1x32x64xbf16> to vector<32x64xbf16>
    %cst = arith.constant dense<0.000000e+00> : vector<256x64xf32>
    %4 = tpu.matmul %1, %3, %cst {dimension_numbers = #tpu.dot_dimension_numbers<[0], [0], [1], [1], [0, 1, 1, 1], [], []>} : vector<32x256xbf16>, vector<32x64xbf16>, vector<256x64xf32> -> vector<256x64xf32>
    %cst_5 = arith.constant dense<0xFF800000> : vector<256xf32>
    %5 = vector.multi_reduction <maximumf>, %4, %cst_5 [1] : vector<256x64xf32> to vector<256xf32>
    %6 = vector.shape_cast %5 : vector<256xf32> to vector<256x1xf32>
    %7 = vector.broadcast %6 : vector<256x1xf32> to vector<256x64xf32>
    %8 = arith.subf %4, %7 : vector<256x64xf32>
    %9 = math.exp %8 : vector<256x64xf32>
    %cst_6 = arith.constant dense<0.000000e+00> : vector<256xf32>
    %10 = vector.multi_reduction <add>, %9, %cst_6 [1] : vector<256x64xf32> to vector<256xf32>
    %11 = vector.shape_cast %10 : vector<256xf32> to vector<256x1xf32>
    %12 = tpu.reciprocal %11 {approx = true} : vector<256x1xf32> -> vector<256x1xf32>
    %13 = vector.broadcast %12 : vector<256x1xf32> to vector<256x64xf32>
    %14 = arith.mulf %9, %13 : vector<256x64xf32>
    %15 = arith.truncf %14 : vector<256x64xf32> to vector<256x64xbf16>
    %c0_7 = arith.constant 0 : index
    %c0_8 = arith.constant 0 : index
    %c0_9 = arith.constant 0 : index
    %16 = vector.load %arg4[%c0_7, %c0_8, %c0_9] : memref<1x16x64xbf16, #tpu.memory_space<vmem>>, vector<1x16x64xbf16>
    %17 = vector.shape_cast %16 : vector<1x16x64xbf16> to vector<16x64xbf16>
    %cst_10 = arith.constant dense<0.000000e+00> : vector<16x256xf32>
    %18 = tpu.matmul %17, %15, %cst_10 {dimension_numbers = #tpu.dot_dimension_numbers<[1], [1], [0], [0], [0, 0, 1, 0], [], []>} : vector<16x64xbf16>, vector<256x64xbf16>, vector<16x256xf32> -> vector<16x256xf32>
    %c0_11 = arith.constant 0 : index
    %c0_12 = arith.constant 0 : index
    %19 = vector.load %arg5[%c0_11, %c0_12] : memref<32x16xbf16, #tpu.memory_space<vmem>>, vector<32x16xbf16>
    %20 = arith.truncf %18 : vector<16x256xf32> to vector<16x256xbf16>
    %cst_13 = arith.constant dense<0.000000e+00> : vector<32x256xf32>
    %21 = tpu.matmul %19, %20, %cst_13 {dimension_numbers = #tpu.dot_dimension_numbers<[1], [0], [0], [1], [0, 0, 1, 1], [], []>} : vector<32x16xbf16>, vector<16x256xbf16>, vector<32x256xf32> -> vector<32x256xf32>
    %c0_14 = arith.constant 0 : index
    %c0_15 = arith.constant 0 : index
    %22 = memref.load %arg6[%c0_14, %c0_15] : memref<1x1xf32, #tpu.memory_space<smem>>
    %23 = vector.broadcast %22 : f32 to vector<32x256xf32>
    %24 = arith.mulf %23, %21 : vector<32x256xf32>
    %25 = arith.extf %1 : vector<32x256xbf16> to vector<32x256xf32>
    %26 = arith.addf %24, %25 : vector<32x256xf32>
    %c0_16 = arith.constant 0 : index
    %c0_17 = arith.constant 0 : index
    %c0_18 = arith.constant 0 : index
    %27 = vector.load %arg7[%c0_16, %c0_17, %c0_18] : memref<1x32x256xf32, #tpu.memory_space<vmem>>, vector<1x32x256xf32>
    %28 = vector.shape_cast %27 : vector<1x32x256xf32> to vector<32x256xf32>
    %29 = vector.shape_cast %26 : vector<32x256xf32> to vector<1x32x256xf32>
    tpu.vector_store %arg7[%c0_16, %c0_17, %c0_18], %29 {strides = array<i32>} : memref<1x32x256xf32, #tpu.memory_space<vmem>>, vector<1x32x256xf32>,
    return
  }
  func.func @transform_0(%arg0: i32, %arg1: i32) -> (i32, i32, i32) {
    %c0_i32 = arith.constant 0 : i32
    %c0_i32_0 = arith.constant 0 : i32
    return %arg0, %c0_i32, %arg1 : i32, i32, i32
  }
  func.func @transform_1(%arg0: i32, %arg1: i32) -> (i32, i32, i32) {
    %c0_i32 = arith.constant 0 : i32
    %c0_i32_0 = arith.constant 0 : i32
    %c0_i32_1 = arith.constant 0 : i32
    return %arg0, %c0_i32, %c0_i32_0 : i32, i32, i32
  }
  func.func @transform_2(%arg0: i32, %arg1: i32) -> (i32, i32, i32) {
    %c0_i32 = arith.constant 0 : i32
    %c0_i32_0 = arith.constant 0 : i32
    %c0_i32_1 = arith.constant 0 : i32
    return %arg0, %c0_i32, %c0_i32_0 : i32, i32, i32
  }
  func.func @transform_3(%arg0: i32, %arg1: i32) -> (i32, i32) {
    %c0_i32 = arith.constant 0 : i32
    %c0_i32_0 = arith.constant 0 : i32
    %c0_i32_1 = arith.constant 0 : i32
    return %c0_i32, %c0_i32_0 : i32, i32
  }
  func.func @transform_4(%arg0: i32, %arg1: i32) -> (i32, i32) {
    %c0_i32 = arith.constant 0 : i32
    %c0_i32_0 = arith.constant 0 : i32
    %c0_i32_1 = arith.constant 0 : i32
    return %c0_i32, %c0_i32_0 : i32, i32
  }
  func.func @transform_5(%arg0: i32, %arg1: i32) -> (i32, i32, i32) {
    %c0_i32 = arith.constant 0 : i32
    %c0_i32_0 = arith.constant 0 : i32
    return %arg0, %c0_i32, %arg1 : i32, i32, i32
  }
}

</mosaic_0001>

<bundles_post_ra>
// kernel: tpu_custom_call.1
= control target key start
LH: loop header
LB: loop body
LE: loop exit
PB: predicated region body
PF: predicated region fallthrough
CT: control target
= control target key end

     0   :  { %s2298_s0 = inlined_call_operand.hbm [shape: bf16[2,32,256], index: 0, kind: input, shape index: {}]   ;;  %s2299_s1 = inlined_call_operand.hbm [shape: bf16[2,32,64], index: 1, kind: input, shape index: {}]   ;;  %s2300_s2 = inlined_call_operand.vmem [shape: bf16[2,16,64], index: 2, kind: input, shape index: {}]   ;;  %s2301_s3 = inlined_call_operand.vmem [shape: bf16[32,16], index: 3, kind: input, shape index: {}]   ;;  %s2302_s4 = inlined_call_operand.<no memory space> [shape: f32[1,1], index: 4, kind: input, shape index: {}]   ;;  %s2303_s5 = inlined_call_operand.hbm [shape: f32[2,32,256], index: 5, kind: output, shape index: {}]  }
   0x1   :  { %2305 = sst [smem:[#allocation14_spill]] %s2298_s0 }
   0x2   :  { %10 = sst [smem:[#allocation2]] %s2302_s4 }
   0x3   :  { %11 = vsyncpa [#allocation4], 0 }
   0x4   :  { %13 = vsyncpa [#allocation4 + $0x1], 0 }
   0x5   :  { %14 = vsyncpa [#allocation7], 0 }
   0x6   :  { %16 = vsyncpa [#allocation7 + $0x1], 0 }
   0x7   :  { %17 = vsyncpa [#allocation5], 0 }
   0x8   :  { %19 = vsyncpa [#allocation5 + $0x1], 0  ;;  %s1706_s20 = smov 0   ;;  %s1708_s21 = smov 0  }
   0x9   :  { %s1710_s22 = smov 0   ;;  %s1712_s23 = smov 0  }
   0xa   :  { %s1714_s24 = smov 0   ;;  %s1716_s25 = smov 0  }
   0xb LB: > { %s1221_s4 = sadd.s32 4294967295, %s1665_s25   ;;  %s1222_s26 = sadd.s32 4294967294, %s1665_s25   ;;  %s1665_s25 = sphi %s1716_s25, %s25_s25   ;;  %s1661_s24 = sphi %s1714_s24, %s2320_s24   ;;  %s1657_s23 = sphi %s1712_s23, %s2319_s23   ;;  %s1653_s22 = sphi %s1710_s22, %s2318_s22   ;;  %s1649_s21 = sphi %s1708_s21, %s2317_s21   ;;  %s1645_s20 = sphi %s1706_s20, %s2316_s20  }
   0xc   : > { %s37_s27 = sadd.s32 1, %s1661_s24  ;;  %s46_s28 = sadd.s32 1, %s1653_s22 }
   0xd   : > { %p39_p0 = scmp.ge.s32.totalorder %s37_s27, 2  ;;  %p53_p1 = scmp.ne.s32.totalorder %s1653_s22, %s1649_s21 }
   0xe   : > { %p54_p2 = scmp.eq.s32.totalorder %s1665_s25, 0  ;;  %p59_p3 = scmp.ne.s32.totalorder %s1649_s21, %s1645_s20 }
   0xf   : > { %s2322_s27 = smov (%p39_p0, %s37_s27), 0  ;;  %p60_p5 = scmp.eq.s32.totalorder %s1221_s4, 0 }
  0x10   : > { %2306 = sst [smem:[#allocation12_spill]] %s2322_s27  ;;  %p1747_p4 = por %p54_p2, %p53_p1 }
  0x11   : > { %s41_s30 = ssub.s32 %s1661_s24, %s2322_s27  ;;  %p179_p6 = scmp.eq.s32.totalorder %s1221_s4, 1 }
  0x12   : > { %p44_p7 = scmp.eq.s32.totalorder %s41_s30, 0  ;;  %p1753_p8 = por %p60_p5, %p59_p3 }
  0x13   : > { %p1757_p9 = por %p179_p6, %p53_p1  ;;  %p185_p10 = scmp.eq.s32.totalorder %s1222_s26, 1 }
  0x14   : > { %s1762_s8 = scalar_select %p44_p7, %s1653_s22, %s46_s28  }
  0x15   : > { %p1764_p11 = por %p185_p10, %p59_p3  ;;  %p1224_p12 = scmp.ge.s32.totalorder %s1665_s25, 2 }
  0x16   : > { %2310 = sst [smem:[#allocation13_spill]] %s1762_s8  ;;  %p1334_p13 = scmp.lt.s32.totalorder %s1665_s25, 2 }
  0x17   : > { %s1771_s10 = sand.u32 1, %s1653_s22   ;;  %s1300_s12 = sshll.u32 %s1661_s24, 5 }
  0x18   : > { %s1225_s11 = sshll.u32 %s1771_s10, 5  ;;  %s2312_s0 = sld [smem:[#allocation14_spill]] }
  0x19   : > { %s215_s16 = scalar_lea.vmem [#allocation3], %s1225_s11  ;;  %p1780_p0 = pnand %p1334_p13, %p1747_p4 }
  0x1a   : > { %s225_s17 = sshll.u32 %s215_s16, 4  ;;  %p1231_p1 = scmp.ge.s32.totalorder %s1665_s25, 1  ;;  %s226_s17 = int_to_ptr.vmem [resolvable:$true] %s225_s17 }
  0x1b   : > { %s212_s4 = scalar_lea.sflag [#allocation4], %s1771_s10  ;;  %s1667_s26 = smov 128  }
  0x1c   : > { %s1668_s28 = smov 8   ;;  %p263_p2 = scmp.lt.s32.totalorder %s1665_s25, 3 }
  0x1d   : > { %s1228_s30 = sshll.u32 %s1771_s10, 4  ;;  %s1301_s11 = sshll.u32 %s1661_s24, 4 }
  0x1e   : > { %s222_s15 = scalar_lea.hbm %s2312_s0, %s1300_s12  ;;  %p264_p3 = pnand %p1231_p1, %p263_p2 }
  0x1f   : > { %s223_s18 = sshll.u32 %s222_s15, 4  ;;  %s244_s29 = scalar_lea.hbm %s2299_s1, %s1301_s11  ;;  %s224_s18 = int_to_ptr.hbm [resolvable:$true] %s223_s18 }
  0x20   : > { %1326 = dma.hbm_to_vmem [thread:$0]  (!%p1780_p0), %s224_s18, 512, %s226_s17, %s212_s4, %s1667_s26, %s1667_s26, %s1668_s28  }
  0x21   : > { %s239_s14 = scalar_lea.vmem [#allocation6], %s1228_s30  ;;  %s245_s16 = sshll.u32 %s244_s29, 4  ;;  %s246_s16 = int_to_ptr.hbm [resolvable:$true] %s245_s16 }
  0x22   : > { %s247_s15 = sshll.u32 %s239_s14, 4  ;;  %s236_s0 = scalar_lea.sflag [#allocation7], %s1771_s10  ;;  %s248_s15 = int_to_ptr.vmem [resolvable:$true] %s247_s15 }
  0x23   : > { %s1669_s27 = smov 64   ;;  %s1670_s8 = smov 4  }
  0x24   : > { %1329 = dma.hbm_to_vmem [thread:$0]  (!%p1780_p0), %s246_s16, 256, %s248_s15, %s236_s0, %s1669_s27, %s1669_s27, %s1670_s8  }
  0x25   : > { %267 = sbr.rel (%p264_p3) target bundleno = 1178 (0x49a), region = 40  ;;  %s1798_s17 = sand.u32 (!%p264_p3), 1, %s1649_s21  }
  0x26   : > { %s1232_s18 = sshll.u32 (!%p264_p3), %s1798_s17, 5  ;;  %s270_s4 = scalar_lea.sflag (!%p264_p3), [#allocation4], %s1798_s17 }
  0x27   : > { %s1802_s26 = scalar_lea.vmem (!%p264_p3), [#allocation3], %s1232_s18 }
  0x2a   : > { %1632 = dma.done.wait (%p1753_p8), %s270_s4, 512  }
  0x2b   : > { %1634 = vsyncadd (%p1753_p8), %s270_s4, 4294966784  ;;  %s1233_s0 = sshll.u32 %s1798_s17, 4  ;;  %s280_s27 = scalar_lea.sflag [#allocation7], %s1798_s17 }
  0x2c   : > { %s283_s8 = scalar_lea.vmem [#allocation6], %s1233_s0 }
  0x2d   : > { %1636 = dma.done.wait (%p1753_p8), %s280_s27, 256  }
  0x2e   : > { %1638 = vsyncadd (%p1753_p8), %s280_s27, 4294967040  ;;  %v1303_v0 = vld [vmem:[%s1802_s26 + $0x4] sm:$0xf]  ;;  %v1239_v1 = vld [vmem:[%s1802_s26] sm:$0xf]  ;;  %vm393_vm0 = vcmask 261120  }
  0x2f   : > { %v1241_v2 = vld [vmem:[%s1802_s26 + $0x8] sm:$0xf0]  ;;  %v1304_v3 = vld [vmem:[%s1802_s26 + $0x4] sm:$0xf0]  ;;  %v1307_v7 = vld [vmem:[%s283_s8] sm:$0xff]  ;;  %vm531_vm1 = vcmask 523264  }
  0x30   : > { %v1244_v4 = vor.u32 %v1303_v0, %v1241_v2  ;;  %v1240_v5 = vor.u32 %v1304_v3, %v1239_v1  ;;  %v1308_v6 = vld [vmem:[%s283_s8 + $0x8] sm:$0xff]  ;;  %v1305_v8 = vld [vmem:[%s1802_s26 + $0x14] sm:$0xf]  ;;  %v1247_v9 = vld [vmem:[%s1802_s26 + $0x10] sm:$0xf]  ;;  %p322_p4 = scmp.lt.s32.totalorder %s1657_s23, 1 }
  0x31   : > { %448 = vmatpush.bf16.msra.mxu0 %v1308_v6  ;;  %1313 = vmatpush.bf16.msra.mxu1 %v1308_v6  ;;  %v1249_v10 = vld [vmem:[%s1802_s26 + $0x18] sm:$0xf0]  ;;  %v1306_v11 = vld [vmem:[%s1802_s26 + $0x14] sm:$0xf0]  ;;  %vm1002_vm2 = vcmask 130048   ;;  %s1047_s14 = sld [smem:[#allocation2]] }
  0x32   : > { %357 = vxpose.binary.xlu0.c.b16.start [1/4] (short) %v1244_v4, %v1240_v5, 128  ;;  %v1248_v12 = vor.u32 %v1306_v11, %v1247_v9  ;;  %v1252_v13 = vor.u32 %v1305_v8, %v1249_v10  ;;  %s323_s6 = scalar_select %p322_p4, %s1657_s23, 1 }
  0x33   : > { %1314 = vmatpush.bf16.msra.mxu3 %v1308_v6  ;;  %s1234_s15 = sshll.u32 %s1798_s17, 6  ;;  %s1312_s18 = sshll.u32 %s1657_s23, 6 }
  0x34   : > { %s1302_s10 = sshll.u32 %s323_s6, 3  ;;  %s2247_s16 = scalar_lea.vmem [#allocation8], %s1234_s15 }
  0x35   : > { %449 = vmatpush.bf16.msra.mxu0 %v1307_v7  ;;  %1315 = vmatpush.bf16.msra.mxu1 %v1307_v7  ;;  %s326_s30 = scalar_lea.vmem %s2300_s2, %s1302_s10  ;;  %s1095_s0 = scalar_lea.hbm %s2303_s5, %s1312_s18 }
  0x36   : > { %s1096_s27 = sshll.u32 %s2247_s16, 4  ;;  %s1098_s8 = sshll.u32 %s1095_s0, 4  ;;  %s1097_s27 = int_to_ptr.vmem [resolvable:$true] %s1096_s27  ;;  %s1099_s8 = int_to_ptr.hbm [resolvable:$true] %s1098_s8 }
  0x37   : > { %1316 = vmatpush.bf16.msra.mxu3 %v1307_v7  ;;  %s1082_s6 = scalar_lea.sflag [#allocation5], %s1798_s17  ;;  %s1593_s10 = sshra.s32 %s1099_s8, 4  ;;  %s1594_s10 = int_to_ptr.hbm [resolvable:$true] %s1593_s10 }
  0x38   : > { %s1595_s23 = scalar_lea.hbm %s1594_s10, 64  ;;  %p1600_p8 = scmp.lt.s32.totalorder %s1594_s10, %s2303_s5 }
  0x39   : > { %p1596_p5 = scmp.ne.s32.totalorder %s1594_s10, %s1595_s23 }
  0x3b   : > { %p1597_p6 = pnand %p1596_p5, %p1757_p9 }
  0x3d   : > { %p1598_p7 = pneg %p1597_p6 }
  0x42   : > { %358 = vxpose.binary.xlu0.c.b16.end [2/4] (short) %v1252_v13, %v1248_v12, 128 }
  0xde   : > { %v365_v14 = vpop.trf.xlu0 }
  0xdf   : > { %1261 = vmatmul.msk.bf16.vlgmr.msra.gmra.mxu0 %vm393_vm0, %v365_v14 }
  0xe6   : > { %v366_v15 = vpop.trf.xlu0 }
  0xe7   : > { %1269 = vmatmul.msk.bf16.vlgmr.msra.gmra.mxu1 %vm393_vm0, %v366_v15 }
  0xee   : > { %v367_v16 = vpop.trf.xlu0 }
  0xef   : > { %1262 = vmatmul.msk.bf16.gmra.mxu0 %vm393_vm0, %v367_v16 }
  0xf6   : > { %v368_v17 = vpop.trf.xlu0 }
  0xf7   : > { %1270 = vmatmul.msk.bf16.gmra.mxu1 %vm393_vm0, %v368_v17 }
  0xfe   : > { %v369_v18 = vpop.trf.xlu0 }
  0xff   : > { %1263 = vmatmul.msk.bf16.gmra.mxu0 %vm393_vm0, %v369_v18 }
 0x106   : > { %v370_v19 = vpop.trf.xlu0 }
 0x107   : > { %1271 = vmatmul.msk.bf16.gmra.mxu1 %vm393_vm0, %v370_v19 }
 0x10e   : > { %v371_v20 = vpop.trf.xlu0 }
 0x10f   : > { %1264 = vmatmul.msk.bf16.gmra.mxu0 %vm393_vm0, %v371_v20 }
 0x116   : > { %v372_v21 = vpop.trf.xlu0 }
 0x117   : > { %1272 = vmatmul.msk.bf16.gmra.mxu1 %vm393_vm0, %v372_v21 }
 0x11e   : > { %v373_v22 = vpop.trf.xlu0 }
 0x11f   : > { %1265 = vmatmul.msk.bf16.gmra.mxu0 %vm393_vm0, %v373_v22 }
 0x126   : > { %v374_v23 = vpop.trf.xlu0 }
 0x127   : > { %1273 = vmatmul.msk.bf16.gmra.mxu1 %vm393_vm0, %v374_v23 }
 0x12e   : > { %v375_v24 = vpop.trf.xlu0 }
 0x12f   : > { %1266 = vmatmul.msk.bf16.gmra.mxu0 %vm393_vm0, %v375_v24 }
 0x136   : > { %v376_v25 = vpop.trf.xlu0 }
 0x137   : > { %1274 = vmatmul.msk.bf16.vlgmr.msra.gmra.mxu3 %vm393_vm0, %v376_v25 }
 0x13e   : > { %v377_v26 = vpop.trf.xlu0 }
 0x13f   : > { %1267 = vmatmul.msk.bf16.gmra.mxu0 %vm393_vm0, %v377_v26 }
 0x146   : > { %v378_v27 = vpop.trf.xlu0 }
 0x147   : > { %1275 = vmatmul.msk.bf16.gmra.mxu3 %vm393_vm0, %v378_v27 }
 0x14e   : > { %v379_v28 = vpop.trf.xlu0 }
 0x14f   : > { %1268 = vmatmul.msk.bf16.gmra.mxu0 %vm393_vm0, %v379_v28 }
 0x156   : > { %v380_v29 = vpop.trf.xlu0 }
 0x157   : > { %1276 = vmatmul.msk.bf16.gmra.mxu3 %vm393_vm0, %v380_v29 }
 0x15c   : > { %v1838_v30 = vpop.f32.mrf.mxu0 }
 0x15d   : > { %v532_v51 = vsel %vm531_vm1, %v1838_v30, -inf }
 0x164   : > { %v1840_v31 = vpop.f32.mrf.mxu0  ;;  %v1844_v33 = vpop.f32.mrf.mxu1 }
 0x165   : > { %v535_v55 = vsel %vm531_vm1, %v1840_v31, -inf  ;;  %v580_v63 = vsel %vm531_vm1, %v1844_v33, -inf }
 0x16c   : > { %v1842_v32 = vpop.f32.mrf.mxu0  ;;  %v1848_v35 = vpop.f32.mrf.mxu1 }
 0x16d   : > { %v538_v47 = vsel %vm531_vm1, %v1842_v32, -inf  ;;  %v583_v62 = vsel %vm531_vm1, %v1848_v35, -inf }
 0x174   : > { %v1846_v34 = vpop.f32.mrf.mxu0  ;;  %v1852_v37 = vpop.f32.mrf.mxu1 }
 0x175   : > { %v541_v52 = vsel %vm531_vm1, %v1846_v34, -inf  ;;  %v586_v60 = vsel %vm531_vm1, %v1852_v37, -inf }
 0x17c   : > { %v1850_v36 = vpop.f32.mrf.mxu0  ;;  %v1856_v39 = vpop.f32.mrf.mxu1 }
 0x17d   : > { %v544_v43 = vsel %vm531_vm1, %v1850_v36, -inf  ;;  %v589_v59 = vsel %vm531_vm1, %v1856_v39, -inf }
 0x184   : > { %v1854_v38 = vpop.f32.mrf.mxu0  ;;  %v1868_v45 = vpop.f32.mrf.mxu1 }
 0x185   : > { %v547_v48 = vsel %vm531_vm1, %v1854_v38, -inf  ;;  %v592_v57 = vsel %vm531_vm1, %v1868_v45, -inf }
 0x18c   : > { %v1858_v40 = vpop.f32.mrf.mxu0  ;;  %v1878_v50 = vpop.f32.mrf.mxu1 }
 0x18d   : > { %v550_v41 = vsel %vm531_vm1, %v1858_v40, -inf  ;;  %v595_v56 = vsel %vm531_vm1, %v1878_v50, -inf }
 0x18e   : > { %551 = vmax.xlane.f32.xlu2 %v550_v41 }
 0x194   : > { %v1862_v42 = vpop.f32.mrf.mxu0  ;;  %v1884_v53 = vpop.f32.mrf.mxu1 }
 0x195   : > { %v553_v44 = vsel %vm531_vm1, %v1862_v42, -inf  ;;  %v598_v54 = vsel %vm531_vm1, %v1884_v53, -inf }
 0x196   : > { %545 = vmax.xlane.f32.xlu2 %v544_v43  ;;  %554 = vmax.xlane.f32.xlu1 %v553_v44 }
 0x19c   : > { %v1870_v46 = vpop.f32.mrf.mxu0  ;;  %v1900_v61 = vpop.f32.mrf.mxu1 }
 0x19d   : > { %v556_v49 = vsel %vm531_vm1, %v1870_v46, -inf  ;;  %v601_v3 = vsel %vm531_vm1, %v1900_v61, -inf }
 0x19e   : > { %539 = vmax.xlane.f32.xlu2 %v538_v47  ;;  %548 = vmax.xlane.f32.xlu1 %v547_v48 }
 0x19f   : > { %557 = vmax.xlane.f32.xlu0 %v556_v49 }
 0x1a4   : > { %v1894_v58 = vpop.f32.mrf.mxu0  ;;  %v1908_v1 = vpop.f32.mrf.mxu1 }
 0x1a5   : > { %v604_v2 = vsel %vm531_vm1, %v1908_v1, -inf  ;;  %v559_v7 = vsel %vm531_vm1, %v1894_v58, -inf }
 0x1a6   : > { %533 = vmax.xlane.f32.xlu2 %v532_v51  ;;  %542 = vmax.xlane.f32.xlu1 %v541_v52 }
 0x1ac   : > { %v1906_v0 = vpop.f32.mrf.mxu0  ;;  %v1930_v12 = vpop.f32.mrf.mxu1 }
 0x1ad   : > { %v562_v10 = vsel %vm531_vm1, %v1906_v0, -inf  ;;  %v607_v14 = vsel %vm531_vm1, %v1930_v12, -inf }
 0x1ae   : > { %536 = vmax.xlane.f32.xlu1 %v535_v55  ;;  %599 = vmax.xlane.f32.xlu2 %v598_v54 }
 0x1b4   : > { %v1914_v4 = vpop.f32.mrf.mxu0 }
 0x1b5   : > { %v565_v6 = vsel %vm531_vm1, %v1914_v4, -inf }
 0x1b6   : > { %596 = vmax.xlane.f32.xlu1 %v595_v56  ;;  %593 = vmax.xlane.f32.xlu2 %v592_v57 }
 0x1ba   : > { %v1916_v5 = vpop.f32.mrf.mxu3 }
 0x1bb   : > { %v610_v8 = vsel %vm531_vm1, %v1916_v5, -inf }
 0x1bc   : > { %v1928_v11 = vpop.f32.mrf.mxu0 }
 0x1bd   : > { %v568_v13 = vsel %vm531_vm1, %v1928_v11, -inf }
 0x1be   : > { %590 = vmax.xlane.f32.xlu1 %v589_v59  ;;  %587 = vmax.xlane.f32.xlu2 %v586_v60 }
 0x1c2   : > { %v1924_v9 = vpop.f32.mrf.mxu3 }
 0x1c3   : > { %v613_v17 = vsel %vm531_vm1, %v1924_v9, -inf }
 0x1c4   : > { %v1938_v16 = vpop.f32.mrf.mxu0 }
 0x1c5   : > { %v571_v18 = vsel %vm531_vm1, %v1938_v16, -inf }
 0x1c6   : > { %584 = vmax.xlane.f32.xlu1 %v583_v62  ;;  %581 = vmax.xlane.f32.xlu2 %v580_v63 }
 0x1ca   : > { %v1936_v15 = vpop.f32.mrf.mxu3 }
 0x1cb   : > { %v616_v22 = vsel %vm531_vm1, %v1936_v15, -inf }
 0x1cc   : > { %v1946_v20 = vpop.f32.mrf.mxu0 }
 0x1cd   : > { %v574_v21 = vsel %vm531_vm1, %v1946_v20, -inf }
 0x1ce   : > { %602 = vmax.xlane.f32.xlu1 %v601_v3  ;;  %605 = vmax.xlane.f32.xlu2 %v604_v2 }
 0x1d2   : > { %v1944_v19 = vpop.f32.mrf.mxu3 }
 0x1d3   : > { %v619_v25 = vsel %vm531_vm1, %v1944_v19, -inf }
 0x1d4   : > { %v1958_v27 = vpop.f32.mrf.mxu0 }
 0x1d5   : > { %v577_v41 = vsel %vm531_vm1, %v1958_v27, -inf }
 0x1d6   : > { %560 = vmax.xlane.f32.xlu1 %v559_v7  ;;  %566 = vmax.xlane.f32.xlu2 %v565_v6 }
 0x1da   : > { %v1952_v23 = vpop.f32.mrf.mxu3 }
 0x1db   : > { %v622_v24 = vsel %vm531_vm1, %v1952_v23, -inf }
 0x1de   : > { %563 = vmax.xlane.f32.xlu1 %v562_v10  ;;  %611 = vmax.xlane.f32.xlu2 %v610_v8 }
 0x1e2   : > { %v1963_v43 = vpop.f32.mrf.mxu3 }
 0x1e3   : > { %v625_v49 = vsel %vm531_vm1, %v1963_v43, -inf }
 0x1e6   : > { %608 = vmax.xlane.f32.xlu1 %v607_v14  ;;  %569 = vmax.xlane.f32.xlu2 %v568_v13 }
 0x1ee   : > { %614 = vmax.xlane.f32.xlu1 %v613_v17  ;;  %572 = vmax.xlane.f32.xlu2 %v571_v18 }
 0x1f6   : > { %617 = vmax.xlane.f32.xlu2 %v616_v22  ;;  %575 = vmax.xlane.f32.xlu1 %v574_v21 }
 0x1fe   : > { %620 = vmax.xlane.f32.xlu1 %v619_v25  ;;  %623 = vmax.xlane.f32.xlu2 %v622_v24 }
 0x201   : > { %v552_v26 = vpop.xlane.xlu2 %551 }
 0x202   : > { %v634_v28 = vsub.f32 %v1858_v40, %v552_v26 }
 0x204   : > { %v672_v29 = vmul.f32 1.442695, %v634_v28 }
 0x206   : > { %1391 = vpow2.f32 %v672_v29  ;;  %578 = vmax.xlane.f32.xlu1 %v577_v41 }
 0x209   : > { %v1965_v44 = vpop.xlane.xlu2 %545  ;;  %v555_v47 = vpop.xlane.xlu1 %554 }
 0x20a   : > { %v635_v48 = vsub.f32 %v1862_v42, %v555_v47 }
 0x20c   : > { %v1970_v51 = vpop.eup %1391  ;;  %v674_v52 = vmul.f32 1.442695, %v635_v48 }
 0x20d   : > { %v742_v40 = vsel %vm531_vm1, %v1970_v51, 0.0 }
 0x20e   : > { %743 = vadd.xlane.f32.xlu2 %v742_v40  ;;  %626 = vmax.xlane.f32.xlu1 %v625_v49  ;;  %1393 = vpow2.f32 %v674_v52 }
 0x211   : > { %v1974_v54 = vpop.xlane.xlu2 %539  ;;  %v1976_v55 = vpop.xlane.xlu1 %548 }
 0x212   : > { %v558_v56 = vpop.xlane.xlu0 %557 }
 0x213   : > { %v636_v57 = vsub.f32 %v1870_v46, %v558_v56 }
 0x214   : > { %v1979_v42 = vpop.eup %1393 }
 0x215   : > { %v676_v59 = vmul.f32 1.442695, %v636_v57  ;;  %v745_v60 = vsel %vm531_vm1, %v1979_v42, 0.0 }
 0x216   : > { %746 = vadd.xlane.f32.xlu1 %v745_v60 }
 0x217   : > { %1395 = vpow2.f32 %v676_v59 }
 0x219   : > { %v1983_v62 = vpop.xlane.xlu2 %533  ;;  %v1985_v63 = vpop.xlane.xlu1 %542 }
 0x21d   : > { %v1987_v2 = vpop.eup %1395 }
 0x21e   : > { %v748_v3 = vsel %vm531_vm1, %v1987_v2, 0.0 }
 0x21f   : > { %749 = vadd.xlane.f32.xlu2 %v748_v3 }
 0x221   : > { %v1991_v6 = vpop.xlane.xlu1 %536  ;;  %v1993_v46 = vpop.xlane.xlu2 %599 }
 0x229   : > { %v1995_v7 = vpop.xlane.xlu1 %596  ;;  %v1997_v8 = vpop.xlane.xlu2 %593 }
 0x231   : > { %v591_v10 = vpop.xlane.xlu1 %590  ;;  %v1999_v13 = vpop.xlane.xlu2 %587 }
 0x232   : > { %v647_v14 = vsub.f32 %v1856_v39, %v591_v10 }
 0x234   : > { %v698_v17 = vmul.f32 1.442695, %v647_v14 }
 0x236   : > { %1397 = vpow2.f32 %v698_v17 }
 0x239   : > { %v2002_v18 = vpop.xlane.xlu1 %584  ;;  %v2004_v21 = vpop.xlane.xlu2 %581 }
 0x23c   : > { %v2006_v22 = vpop.eup %1397 }
 0x23d   : > { %v781_v24 = vsel %vm531_vm1, %v2006_v22, 0.0 }
 0x23e   : > { %782 = vadd.xlane.f32.xlu0 %v781_v24 }
 0x241   : > { %v2010_v25 = vpop.xlane.xlu1 %602  ;;  %v2012_v26 = vpop.xlane.xlu2 %605 }
 0x249   : > { %v561_v28 = vpop.xlane.xlu1 %560  ;;  %v567_v29 = vpop.xlane.xlu2 %566 }
 0x24a   : > { %v637_v39 = vsub.f32 %v1894_v58, %v561_v28  ;;  %v639_v47 = vsub.f32 %v1914_v4, %v567_v29 }
 0x24c   : > { %v678_v41 = vmul.f32 1.442695, %v637_v39  ;;  %v682_v48 = vmul.f32 1.442695, %v639_v47 }
 0x24e   : > { %1399 = vpow2.f32 %v678_v41 }
 0x24f   : > { %1401 = vpow2.f32 %v682_v48 }
 0x251   : > { %v564_v49 = vpop.xlane.xlu1 %563  ;;  %v612_v52 = vpop.xlane.xlu2 %611 }
 0x252   : > { %v638_v40 = vsub.f32 %v1906_v0, %v564_v49 }
 0x254   : > { %v2017_v56 = vpop.eup %1399  ;;  %v680_v57 = vmul.f32 1.442695, %v638_v40 }
 0x255   : > { %v751_v59 = vsel %vm531_vm1, %v2017_v56, 0.0  ;;  %v2023_v3 = vpop.eup %1401 }
 0x256   : > { %1403 = vpow2.f32 %v680_v57  ;;  %752 = vadd.xlane.f32.xlu1 %v751_v59  ;;  %v757_v0 = vsel %vm531_vm1, %v2023_v3, 0.0 }
 0x259   : > { %v2021_v60 = vpop.xlane.xlu1 %608  ;;  %v570_v58 = vpop.xlane.xlu2 %569 }
 0x25a   : > { %v640_v4 = vsub.f32 %v1928_v11, %v570_v58 }
 0x25c   : > { %v2026_v10 = vpop.eup %1403  ;;  %v684_v14 = vmul.f32 1.442695, %v640_v4 }
 0x25d   : > { %v754_v17 = vsel %vm531_vm1, %v2026_v10, 0.0 }
 0x25e   : > { %758 = vadd.xlane.f32.xlu1 %v757_v0  ;;  %755 = vadd.xlane.f32.xlu2 %v754_v17  ;;  %1405 = vpow2.f32 %v684_v14  ;;  %v632_v0 = vsub.f32 %v1850_v36, %v1965_v44 }
 0x260   : > { %v668_v17 = vmul.f32 1.442695, %v632_v0 }
 0x261   : > { %v2032_v24 = vpop.xlane.xlu1 %614  ;;  %v573_v28 = vpop.xlane.xlu2 %572 }
 0x262   : > { %v641_v29 = vsub.f32 %v1938_v16, %v573_v28 }
 0x264   : > { %v686_v39 = vmul.f32 1.442695, %v641_v29  ;;  %v2035_v41 = vpop.eup %1405 }
 0x265   : > { %v760_v11 = vsel %vm531_vm1, %v2035_v41, 0.0 }
 0x266   : > { %1407 = vpow2.f32 %v686_v39  ;;  %761 = vadd.xlane.f32.xlu2 %v760_v11 }
 0x269   : > { %v576_v47 = vpop.xlane.xlu1 %575  ;;  %v618_v48 = vpop.xlane.xlu2 %617 }
 0x26a   : > { %v642_v49 = vsub.f32 %v1946_v20, %v576_v47  ;;  %v656_v59 = vsub.f32 %v1936_v15, %v618_v48  ;;  %v654_v47 = vsub.f32 %v1916_v5, %v612_v52 }
 0x26c   : > { %v688_v40 = vmul.f32 1.442695, %v642_v49  ;;  %v2040_v57 = vpop.eup %1407  ;;  %v716_v58 = vmul.f32 1.442695, %v656_v59  ;;  %v712_v49 = vmul.f32 1.442695, %v654_v47 }
 0x26d   : > { %v763_v16 = vsel %vm531_vm1, %v2040_v57, 0.0 }
 0x26e   : > { %1409 = vpow2.f32 %v688_v40  ;;  %764 = vadd.xlane.f32.xlu1 %v763_v16 }
 0x26f   : > { %1411 = vpow2.f32 %v716_v58 }
 0x270   : > { %1413 = vpow2.f32 %v668_v17 }
 0x271   : > { %v621_v4 = vpop.xlane.xlu1 %620  ;;  %v624_v48 = vpop.xlane.xlu2 %623 }
 0x272   : > { %v657_v39 = vsub.f32 %v1944_v19, %v621_v4  ;;  %v633_v19 = vsub.f32 %v1854_v38, %v1976_v55  ;;  %v658_v5 = vsub.f32 %v1952_v23, %v624_v48  ;;  %v655_v23 = vsub.f32 %v1924_v9, %v2032_v24 }
 0x273   : > { %v630_v55 = vsub.f32 %v1842_v32, %v1974_v54 }
 0x274   : > { %v2045_v14 = vpop.eup %1409  ;;  %v718_v44 = vmul.f32 1.442695, %v657_v39  ;;  %v670_v4 = vmul.f32 1.442695, %v633_v19  ;;  %v720_v0 = vmul.f32 1.442695, %v658_v5 }
 0x275   : > { %v766_v20 = vsel %vm531_vm1, %v2045_v14, 0.0  ;;  %v2052_v29 = vpop.eup %1411  ;;  %v664_v48 = vmul.f32 1.442695, %v630_v55 }
 0x276   : > { %767 = vadd.xlane.f32.xlu2 %v766_v20  ;;  %v808_v36 = vsel %vm531_vm1, %v2052_v29, 0.0  ;;  %v2058_v59 = vpop.eup %1413 }
 0x277   : > { %v736_v58 = vsel %vm531_vm1, %v2058_v59, 0.0 }
 0x279   : > { %v579_v28 = vpop.xlane.xlu1 %578 }
 0x27a   : > { %v643_v15 = vsub.f32 %v1958_v27, %v579_v28 }
 0x27c   : > { %v690_v11 = vmul.f32 1.442695, %v643_v15 }
 0x27e   : > { %1415 = vpow2.f32 %v690_v11  ;;  %809 = vadd.xlane.f32.xlu2 %v808_v36  ;;  %v714_v11 = vmul.f32 1.442695, %v655_v23 }
 0x27f   : > { %1417 = vpow2.f32 %v718_v44 }
 0x280   : > { %1419 = vpow2.f32 %v712_v49  ;;  %v652_v49 = vsub.f32 %v1908_v1, %v2012_v26  ;;  %v628_v1 = vsub.f32 %v1838_v30, %v1983_v62  ;;  %v650_v30 = vsub.f32 %v1884_v53, %v1993_v46 }
 0x281   : > { %v627_v40 = vpop.xlane.xlu1 %626  ;;  %v744_v16 = vpop.xlane.xlu2 %743  ;;  %v648_v53 = vsub.f32 %v1868_v45, %v1997_v8  ;;  %v646_v45 = vsub.f32 %v1852_v37, %v1999_v13  ;;  %v645_v37 = vsub.f32 %v1848_v35, %v2002_v18 }
 0x282   : > { %1421 = vrcp.f32 %v744_v16  ;;  %v659_v24 = vsub.f32 %v1963_v43, %v627_v40  ;;  %v708_v5 = vmul.f32 1.442695, %v652_v49  ;;  %v631_v40 = vsub.f32 %v1846_v34, %v1985_v63 }
 0x283   : > { %v653_v34 = vsub.f32 %v1930_v12, %v2021_v60  ;;  %v704_v55 = vmul.f32 1.442695, %v650_v30  ;;  %v629_v12 = vsub.f32 %v1840_v31, %v1991_v6  ;;  %v651_v31 = vsub.f32 %v1900_v61, %v2010_v25 }
 0x284   : > { %v2060_v27 = vpop.eup %1415  ;;  %v696_v49 = vmul.f32 1.442695, %v646_v45  ;;  %v649_v61 = vsub.f32 %v1878_v50, %v1995_v7  ;;  %v644_v50 = vsub.f32 %v1844_v33, %v2004_v21 }
 0x285   : > { %v769_v52 = vsel %vm531_vm1, %v2060_v27, 0.0  ;;  %v2069_v20 = vpop.eup %1417  ;;  %v710_v23 = vmul.f32 1.442695, %v653_v34 }
 0x286   : > { %770 = vadd.xlane.f32.xlu1 %v769_v52  ;;  %737 = vadd.xlane.f32.xlu2 %v736_v58  ;;  %v2071_v38 = vpop.eup %1419  ;;  %v811_v28 = vsel %vm531_vm1, %v2069_v20, 0.0  ;;  %v666_v58 = vmul.f32 1.442695, %v631_v40  ;;  %v692_v18 = vmul.f32 1.442695, %v644_v50 }
 0x287   : > { %v802_v15 = vsel %vm531_vm1, %v2071_v38, 0.0 }
 0x288   : > { %v1422_v39 = vpop.eup %1421 }
 0x289   : > { %v747_v17 = vpop.xlane.xlu1 %746  ;;  %v2084_v9 = vmul.f32 %v1422_v39, %v1970_v51  ;;  %v662_v39 = vmul.f32 1.442695, %v629_v12 }
 0x28a   : > { %1423 = vrcp.f32 %v747_v17 }
 0x28b   : > { %1425 = vpow2.f32 %v670_v4  ;;  %v660_v4 = vmul.f32 1.442695, %v628_v1 }
 0x28c   : > { %1427 = vpow2.f32 %v720_v0 }
 0x28d   : > { %1429 = vpow2.f32 %v714_v11  ;;  %v700_v11 = vmul.f32 1.442695, %v648_v53 }
 0x28e   : > { %812 = vadd.xlane.f32.xlu1 %v811_v28  ;;  %803 = vadd.xlane.f32.xlu2 %v802_v15  ;;  %1431 = vpow2.f32 %v664_v48 }
 0x290   : > { %v1424_v47 = vpop.eup %1423 }
 0x291   : > { %v2081_v36 = vpop.eup %1425  ;;  %v2087_v32 = vmul.f32 %v1424_v47, %v1979_v42  ;;  %v722_v42 = vmul.f32 1.442695, %v659_v24  ;;  %v706_v24 = vmul.f32 1.442695, %v651_v31 }
 0x292   : > { %v2089_v54 = vpop.eup %1427  ;;  %v739_v19 = vsel %vm531_vm1, %v2081_v36, 0.0  ;;  %v750_v21 = vpop.xlane.xlu2 %749 }
 0x293   : > { %v887_v44 = vpack.c.bf16 %v2087_v32, %v2084_v9  ;;  %v814_v51 = vsel %vm531_vm1, %v2089_v54, 0.0  ;;  %v2100_v52 = vpop.eup %1429  ;;  %1433 = vpow2.f32 %v722_v42  ;;  %v702_v42 = vmul.f32 1.442695, %v649_v61 }
 0x294   : > { %v2102_v43 = vpop.eup %1431  ;;  %1435 = vpow2.f32 %v708_v5  ;;  %v805_v26 = vsel %vm531_vm1, %v2100_v52, 0.0  ;;  %v694_v5 = vmul.f32 1.442695, %v645_v37 }
 0x295   : > { %v730_v16 = vsel %vm531_vm1, %v2102_v43, 0.0  ;;  %1437 = vpow2.f32 %v666_v58 }
 0x296   : > { %740 = vadd.xlane.f32.xlu1 %v739_v19  ;;  %815 = vadd.xlane.f32.xlu2 %v814_v51  ;;  %1439 = vpow2.f32 %v660_v4 }
 0x297   : > { %1441 = vpow2.f32 %v710_v23 }
 0x298   : > { %1443 = vpow2.f32 %v704_v55 }
 0x299   : > { %v2112_v0 = vpop.eup %1433  ;;  %1445 = vpow2.f32 %v662_v39 }
 0x29a   : > { %v2114_v17 = vpop.eup %1435  ;;  %v817_v62 = vsel %vm531_vm1, %v2112_v0, 0.0  ;;  %1447 = vpow2.f32 %v700_v11 }
 0x29b   : > { %v796_v63 = vsel %vm531_vm1, %v2114_v17, 0.0  ;;  %v2124_v28 = vpop.eup %1437  ;;  %1449 = vpow2.f32 %v706_v24 }
 0x29c   : > { %v2126_v15 = vpop.eup %1439  ;;  %v733_v46 = vsel %vm531_vm1, %v2124_v28, 0.0  ;;  %1451 = vpow2.f32 %v696_v49 }
 0x29d   : > { %v724_v60 = vsel %vm531_vm1, %v2126_v15, 0.0  ;;  %v2136_v47 = vpop.eup %1441  ;;  %1453 = vpow2.f32 %v702_v42 }
 0x29e   : > { %806 = vadd.xlane.f32.xlu1 %v805_v26  ;;  %731 = vadd.xlane.f32.xlu2 %v730_v16  ;;  %v2138_v48 = vpop.eup %1443  ;;  %v799_v6 = vsel %vm531_vm1, %v2136_v47, 0.0  ;;  %1455 = vpow2.f32 %v694_v5 }
 0x29f   : > { %v790_v8 = vsel %vm531_vm1, %v2138_v48, 0.0  ;;  %v2148_v19 = vpop.eup %1445  ;;  %1457 = vpow2.f32 %v692_v18 }
 0x2a0   : > { %v2150_v51 = vpop.eup %1447  ;;  %v727_v13 = vsel %vm531_vm1, %v2148_v19, 0.0 }
 0x2a1   : > { %v784_v25 = vsel %vm531_vm1, %v2150_v51, 0.0  ;;  %v2160_v40 = vpop.eup %1449 }
 0x2a2   : > { %v2162_v1 = vpop.eup %1451  ;;  %v793_v35 = vsel %vm531_vm1, %v2160_v40, 0.0 }
 0x2a3   : > { %v778_v7 = vsel %vm531_vm1, %v2162_v1, 0.0  ;;  %v2170_v26 = vpop.eup %1453 }
 0x2a4   : > { %v2172_v16 = vpop.eup %1455  ;;  %v787_v58 = vsel %vm531_vm1, %v2170_v26, 0.0 }
 0x2a5   : > { %v775_v33 = vsel %vm531_vm1, %v2172_v16, 0.0  ;;  %v2178_v4 = vpop.eup %1457 }
 0x2a6   : > { %818 = vadd.xlane.f32.xlu1 %v817_v62  ;;  %797 = vadd.xlane.f32.xlu2 %v796_v63  ;;  %v772_v34 = vsel %vm531_vm1, %v2178_v4, 0.0 }
 0x2ae   : > { %734 = vadd.xlane.f32.xlu1 %v733_v46  ;;  %725 = vadd.xlane.f32.xlu2 %v724_v60 }
 0x2b6   : > { %800 = vadd.xlane.f32.xlu1 %v799_v6  ;;  %791 = vadd.xlane.f32.xlu2 %v790_v8 }
 0x2be   : > { %728 = vadd.xlane.f32.xlu1 %v727_v13  ;;  %785 = vadd.xlane.f32.xlu2 %v784_v25 }
 0x2c6   : > { %794 = vadd.xlane.f32.xlu1 %v793_v35  ;;  %779 = vadd.xlane.f32.xlu2 %v778_v7 }
 0x2c9   : > { %v753_v62 = vpop.xlane.xlu1 %752 }
 0x2ce   : > { %788 = vadd.xlane.f32.xlu1 %v787_v58  ;;  %776 = vadd.xlane.f32.xlu2 %v775_v33 }
 0x2d1   : > { %v756_v30 = vpop.xlane.xlu2 %755  ;;  %v759_v23 = vpop.xlane.xlu1 %758 }
 0x2d6   : > { %773 = vadd.xlane.f32.xlu1 %v772_v34 }
 0x2d9   : > { %v762_v63 = vpop.xlane.xlu2 %761 }
 0x2e1   : > { %v765_v12 = vpop.xlane.xlu1 %764 }
 0x2e9   : > { %v768_v55 = vpop.xlane.xlu2 %767 }
 0x2ea   : > { %1459 = vrcp.f32 %v768_v55 }
 0x2f0   : > { %v1460_v39 = vpop.eup %1459 }
 0x2f1   : > { %v810_v53 = vpop.xlane.xlu2 %809  ;;  %v866_v45 = vmul.f32 %v1460_v39, %v2045_v14 }
 0x2f9   : > { %v771_v46 = vpop.xlane.xlu1 %770  ;;  %v738_v60 = vpop.xlane.xlu2 %737 }
 0x2fa   : > { %1461 = vrcp.f32 %v771_v46 }
 0x2fb   : > { %1463 = vrcp.f32 %v765_v12 }
 0x2fc   : > { %1465 = vrcp.f32 %v762_v63 }
 0x2fd   : > { %1467 = vrcp.f32 %v759_v23 }
 0x2fe   : > { %1469 = vrcp.f32 %v756_v30 }
 0x2ff   : > { %1471 = vrcp.f32 %v753_v62 }
 0x300   : > { %v1462_v11 = vpop.eup %1461  ;;  %1473 = vrcp.f32 %v750_v21 }
 0x301   : > { %v813_v31 = vpop.xlane.xlu1 %812  ;;  %v867_v6 = vmul.f32 %v1462_v11, %v2060_v27  ;;  %v1464_v8 = vpop.eup %1463 }
 0x302   : > { %v804_v24 = vpop.xlane.xlu2 %803  ;;  %v1466_v61 = vpop.eup %1465  ;;  %v865_v13 = vmul.f32 %v1464_v8, %v2040_v57 }
 0x303   : > { %v891_v49 = vpack.c.bf16 %v867_v6, %v866_v45  ;;  %v864_v25 = vmul.f32 %v1466_v61, %v2035_v41  ;;  %v1468_v42 = vpop.eup %1467 }
 0x304   : > { %v1470_v35 = vpop.eup %1469  ;;  %v863_v18 = vmul.f32 %v1468_v42, %v2023_v3 }
 0x305   : > { %v932_v37 = vsel %vm531_vm1, %v891_v49, 0  ;;  %v890_v50 = vpack.c.bf16 %v865_v13, %v864_v25  ;;  %v862_v7 = vmul.f32 %v1470_v35, %v2026_v10  ;;  %v1472_v57 = vpop.eup %1471 }
 0x306   : > { %958 = vmatpush.bf16.xpose.msrb.mxu1 %v932_v37  ;;  %v1474_v30 = vpop.eup %1473  ;;  %v861_v63 = vmul.f32 %v1472_v57, %v2017_v56 }
 0x307   : > { %v929_v27 = vsel %vm531_vm1, %v890_v50, 0  ;;  %v889_v33 = vpack.c.bf16 %v863_v18, %v862_v7  ;;  %v860_v62 = vmul.f32 %v1474_v30, %v1987_v2 }
 0x309   : > { %v741_v5 = vpop.xlane.xlu1 %740  ;;  %v926_v41 = vsel %vm531_vm1, %v889_v33, 0  ;;  %v888_v55 = vpack.c.bf16 %v861_v63, %v860_v62 }
 0x30a   : > { %v816_v14 = vpop.xlane.xlu2 %815 }
 0x30b   : > { %1475 = vrcp.f32 %v816_v14  ;;  %v923_v3 = vsel %vm531_vm1, %v888_v55, 0 }
 0x30e   : > { %959 = vmatpush.bf16.xpose.msrb.mxu1 %v929_v27 }
 0x311   : > { %v807_v58 = vpop.xlane.xlu1 %806  ;;  %v1476_v21 = vpop.eup %1475 }
 0x312   : > { %v732_v34 = vpop.xlane.xlu2 %731  ;;  %v882_v56 = vmul.f32 %v1476_v21, %v2089_v54 }
 0x316   : > { %960 = vmatpush.bf16.xpose.msrb.mxu1 %v926_v41 }
 0x319   : > { %v819_v23 = vpop.xlane.xlu1 %818 }
 0x31a   : > { %1477 = vrcp.f32 %v819_v23  ;;  %v798_v10 = vpop.xlane.xlu2 %797 }
 0x31b   : > { %1479 = vrcp.f32 %v813_v31 }
 0x31c   : > { %1481 = vrcp.f32 %v741_v5 }
 0x31d   : > { %1483 = vrcp.f32 %v810_v53  ;;  %v920_v53 = vsel %vm531_vm1, %v887_v44, 0 }
 0x31e   : > { %1485 = vrcp.f32 %v738_v60  ;;  %961 = vmatpush.bf16.xpose.msrb.mxu1 %v923_v3 }
 0x31f   : > { %1487 = vrcp.f32 %v807_v58 }
 0x320   : > { %v1478_v12 = vpop.eup %1477 }
 0x321   : > { %v1480_v46 = vpop.eup %1479  ;;  %v735_v39 = vpop.xlane.xlu1 %734  ;;  %v883_v2 = vmul.f32 %v1478_v12, %v2112_v0 }
 0x322   : > { %v1482_v11 = vpop.eup %1481  ;;  %v726_v6 = vpop.xlane.xlu2 %725  ;;  %1489 = vrcp.f32 %v735_v39  ;;  %v881_v54 = vmul.f32 %v1480_v46, %v2069_v20 }
 0x323   : > { %v1484_v45 = vpop.eup %1483  ;;  %v899_v8 = vpack.c.bf16 %v883_v2, %v882_v56  ;;  %1491 = vrcp.f32 %v804_v24  ;;  %v857_v49 = vmul.f32 %v1482_v11, %v2081_v36  ;;  %v783_v12 = vpop.xlane.xlu0 %782 }
 0x324   : > { %v1486_v31 = vpop.eup %1485  ;;  %1493 = vrcp.f32 %v732_v34  ;;  %v880_v61 = vmul.f32 %v1484_v45, %v2052_v29 }
 0x325   : > { %v956_v60 = vsel %vm531_vm1, %v899_v8, 0  ;;  %v856_v0 = vmul.f32 %v1486_v31, %v2058_v59  ;;  %v1488_v37 = vpop.eup %1487 }
 0x326   : > { %962 = vmatpush.bf16.xpose.msrb.mxu1 %v920_v53  ;;  %972 = vmatpush.bf16.xpose.msra.mxu2 %v956_v60  ;;  %v898_v9 = vpack.c.bf16 %v881_v54, %v880_v61  ;;  %v879_v59 = vmul.f32 %v1488_v37, %v2100_v52 }
 0x327   : > { %v886_v25 = vpack.c.bf16 %v857_v49, %v856_v0 }
 0x328   : > { %v1490_v32 = vpop.eup %1489  ;;  %v953_v20 = vsel %vm531_vm1, %v898_v9, 0 }
 0x329   : > { %v801_v13 = vpop.xlane.xlu1 %800  ;;  %v1492_v44 = vpop.eup %1491  ;;  %v917_v36 = vsel %vm531_vm1, %v886_v25, 0  ;;  %v855_v5 = vmul.f32 %v1490_v32, %v2124_v28  ;;  %v1310_v32 = vld [vmem:[%s2301_s3] sm:$0xff] }
 0x32a   : > { %v1494_v24 = vpop.eup %1493  ;;  %1495 = vrcp.f32 %v801_v13  ;;  %v792_v42 = vpop.xlane.xlu2 %791  ;;  %v878_v50 = vmul.f32 %v1492_v44, %v2071_v38 }
 0x32b   : > { %1497 = vrcp.f32 %v798_v10  ;;  %v854_v29 = vmul.f32 %v1494_v24, %v2102_v43 }
 0x32c   : > { %1499 = vrcp.f32 %v726_v6  ;;  %v897_v27 = vpack.c.bf16 %v879_v59, %v878_v50  ;;  %v330_v50 = vld [vmem:[%s1802_s26 + $0x8] sm:$0xff] }
 0x32d   : > { %v885_v14 = vpack.c.bf16 %v855_v5, %v854_v29 }
 0x32e   : > { %963 = vmatpush.bf16.xpose.msrb.mxu1 %v917_v36  ;;  %973 = vmatpush.bf16.xpose.msra.mxu2 %v953_v20  ;;  %v950_v52 = vsel %vm531_vm1, %v897_v27, 0  ;;  %v1048_v36 = vstv %s1047_s14 }
 0x32f   : > { %v914_v28 = vsel %vm531_vm1, %v885_v14, 0 }
 0x330   : > { %v1496_v7 = vpop.eup %1495 }
 0x331   : > { %v729_v35 = vpop.xlane.xlu1 %728  ;;  %v1498_v18 = vpop.eup %1497  ;;  %v877_v58 = vmul.f32 %v1496_v7, %v2136_v47 }
 0x332   : > { %1501 = vrcp.f32 %v729_v35  ;;  %v1500_v33 = vpop.eup %1499  ;;  %v786_v43 = vpop.xlane.xlu2 %785  ;;  %v876_v38 = vmul.f32 %v1498_v18, %v2114_v17  ;;  %v1059_v35 = vunpack.c.l.bf16 %v330_v50  ;;  %v331_v18 = vld [vmem:[%s1802_s26 + $0x10] sm:$0xff] }
 0x333   : > { %1503 = vrcp.f32 %v792_v42  ;;  %v852_v30 = vmul.f32 %v1500_v33, %v2126_v15  ;;  %v329_v42 = vld [vmem:[%s1802_s26] sm:$0xff] }
 0x334   : > { %v896_v63 = vpack.c.bf16 %v877_v58, %v876_v38  ;;  %v1057_v20 = vunpack.c.l.bf16 %v329_v42 }
 0x336   : > { %964 = vmatpush.bf16.xpose.msrb.mxu1 %v914_v28  ;;  %974 = vmatpush.bf16.xpose.msra.mxu2 %v950_v52  ;;  %v947_v23 = vsel %vm531_vm1, %v896_v63, 0  ;;  %v1061_v28 = vunpack.c.l.bf16 %v331_v18 }
 0x338   : > { %v1502_v57 = vpop.eup %1501 }
 0x339   : > { %v795_v34 = vpop.xlane.xlu1 %794  ;;  %v853_v41 = vmul.f32 %v1502_v57, %v2148_v19  ;;  %v1504_v55 = vpop.eup %1503  ;;  %v1309_v19 = vld [vmem:[%s326_s30] sm:$0xff]  ;;  %s1599_s30 = scalar_lea.hbm %s2303_s5, 128 }
 0x33a   : > { %1505 = vrcp.f32 %v795_v34  ;;  %v780_v15 = vpop.xlane.xlu2 %779  ;;  %v874_v3 = vmul.f32 %v1504_v55, %v2138_v48  ;;  %p1601_p10 = scmp.lt.s32.totalorder %s1599_s30, %s1595_s23 }
 0x33b   : > { %v884_v62 = vpack.c.bf16 %v853_v41, %v852_v30  ;;  %1507 = vrcp.f32 %v786_v43  ;;  %v332_v43 = vld [vmem:[%s1802_s26 + $0x18] sm:$0xff]  ;;  %v1058_v41 = vunpack.c.h.bf16 %v329_v42 }
 0x33c   : > { %v1063_v38 = vunpack.c.l.bf16 %v332_v43  ;;  %p1602_p13 = por %p1601_p10, %p1600_p8 }
 0x33d   : > { %v911_v47 = vsel %vm531_vm1, %v884_v62, 0 }
 0x33e   : > { %965 = vmatpush.bf16.xpose.msrb.mxu1 %v911_v47  ;;  %975 = vmatpush.bf16.xpose.msra.mxu2 %v947_v23  ;;  %v1060_v23 = vunpack.c.h.bf16 %v330_v50  ;;  %p1603_p0 = pnand %p1602_p13, %p1598_p7 }
 0x340   : > { %v1506_v17 = vpop.eup %1505 }
 0x341   : > { %v789_v10 = vpop.xlane.xlu1 %788  ;;  %v875_v21 = vmul.f32 %v1506_v17, %v2160_v40  ;;  %v1508_v56 = vpop.eup %1507 }
 0x342   : > { %1509 = vrcp.f32 %v789_v10  ;;  %v872_v45 = vmul.f32 %v1508_v56, %v2150_v51  ;;  %v777_v8 = vpop.xlane.xlu2 %776  ;;  %v1062_v10 = vunpack.c.h.bf16 %v331_v18 }
 0x343   : > { %v895_v46 = vpack.c.bf16 %v875_v21, %v874_v3  ;;  %1511 = vrcp.f32 %v780_v15 }
 0x344   : > { %1513 = vrcp.f32 %v783_v12  ;;  %v1064_v12 = vunpack.c.h.bf16 %v332_v43 }
 0x345   : > { %1281 = vmatmul.msk.bf16.vlgmr.msrb.gmra.mxu1 %vm531_vm1, %v1309_v19  ;;  %v944_v39 = vsel %vm531_vm1, %v895_v46, 0 }
 0x346   : > { %976 = vmatpush.bf16.xpose.msra.mxu2 %v944_v39 }
 0x348   : > { %v1510_v2 = vpop.eup %1509 }
 0x349   : > { %v774_v11 = vpop.xlane.xlu1 %773  ;;  %v873_v6 = vmul.f32 %v1510_v2, %v2170_v26  ;;  %v1512_v48 = vpop.eup %1511 }
 0x34a   : > { %v1514_v31 = vpop.eup %1513  ;;  %1515 = vrcp.f32 %v774_v11  ;;  %v870_v60 = vmul.f32 %v1512_v48, %v2162_v1 }
 0x34b   : > { %v894_v40 = vpack.c.bf16 %v873_v6, %v872_v45  ;;  %1517 = vrcp.f32 %v777_v8  ;;  %v871_v49 = vmul.f32 %v1514_v31, %v2006_v22 }
 0x34d   : > { %v941_v53 = vsel %vm531_vm1, %v894_v40, 0  ;;  %v893_v54 = vpack.c.bf16 %v871_v49, %v870_v60 }
 0x34e   : > { %977 = vmatpush.bf16.xpose.msra.mxu2 %v941_v53 }
 0x34f   : > { %v938_v51 = vsel %vm531_vm1, %v893_v54, 0 }
 0x350   : > { %v1516_v0 = vpop.eup %1515 }
 0x351   : > { %v1518_v61 = vpop.eup %1517  ;;  %v868_v26 = vmul.f32 %v1516_v0, %v2178_v4 }
 0x352   : > { %v869_v37 = vmul.f32 %v1518_v61, %v2172_v16  ;;  %v1311_v16 = vld [vmem:[%s2301_s3 + $0x8] sm:$0xff] }
 0x354   : > { %v892_v13 = vpack.c.bf16 %v869_v37, %v868_v26 }
 0x356   : > { %978 = vmatpush.bf16.xpose.msra.mxu2 %v938_v51  ;;  %v935_v25 = vsel %vm531_vm1, %v892_v13, 0 }
 0x35e   : > { %979 = vmatpush.bf16.xpose.msra.mxu2 %v935_v25 }
 0x365   : > { %1282 = vmatmul.msk.bf16.vlgmr.msra.gmra.mxu2 %vm531_vm1, %v1309_v19 }
 0x3c2   : > { %v967_v1 = vpop.f32.mrf.mxu1 }
 0x3ca   : > { %v969_v9 = vpop.f32.mrf.mxu1 }
 0x3cb   : > { %v990_v22 = vpack.c.bf16 %v969_v9, %v967_v1 }
 0x3cd   : > { %1016 = vmatpush.bf16.msrb.mxu3 %v990_v22 }
 0x3d0   : > { %1291 = vmatmul.msk.bf16.vlgmr.msrb.gmra.mxu3 %vm1002_vm2, %v1310_v32 }
 0x3e0   : > { %1292 = vmatmul.msk.bf16.gmra.mxu3 %vm1002_vm2, %v1311_v16 }
 0x3e8   : > { %v981_v4 = vpop.f32.mrf.mxu2 }
 0x3f0   : > { %v983_v44 = vpop.f32.mrf.mxu2 }
 0x3f1   : > { %v991_v24 = vpack.c.bf16 %v983_v44, %v981_v4 }
 0x3f3   : > { %1035 = vmatpush.bf16.msra.mxu3 %v991_v24 }
 0x3f6   : > { %1293 = vmatmul.msk.bf16.vlgmr.msra.gmra.mxu3 %vm1002_vm2, %v1310_v32 }
 0x406   : > { %1294 = vmatmul.msk.bf16.gmra.mxu3 %vm1002_vm2, %v1311_v16 }
 0x453   : > { %v1018_v5 = vpop.f32.mrf.mxu3 }
 0x454   : > { %v1049_v59 = vmul.f32 %v1048_v36, %v1018_v5 }
 0x456   : > { %v1065_v29 = vadd.f32 %v1057_v20, %v1049_v59 }
 0x458   : > { %1073 = vst [vmem:[%s2247_s16] sm:$0xff] %v1065_v29 }
 0x45b   : > { %v1020_v14 = vpop.f32.mrf.mxu3 }
 0x45c   : > { %v1051_v27 = vmul.f32 %v1048_v36, %v1020_v14 }
 0x45e   : > { %v1067_v7 = vadd.f32 %v1059_v35, %v1051_v27 }
 0x460   : > { %1075 = vst [vmem:[%s2247_s16 + $0x10] sm:$0xff] %v1067_v7 }
 0x463   : > { %v1023_v52 = vpop.f32.mrf.mxu3 }
 0x464   : > { %v1053_v58 = vmul.f32 %v1048_v36, %v1023_v52 }
 0x466   : > { %v1069_v33 = vadd.f32 %v1061_v28, %v1053_v58 }
 0x468   : > { %1077 = vst [vmem:[%s2247_s16 + $0x20] sm:$0xff] %v1069_v33 }
 0x46b   : > { %v1025_v57 = vpop.f32.mrf.mxu3 }
 0x46c   : > { %v1055_v34 = vmul.f32 %v1048_v36, %v1025_v57 }
 0x46e   : > { %v1071_v30 = vadd.f32 %v1063_v38, %v1055_v34 }
 0x470   : > { %1079 = vst [vmem:[%s2247_s16 + $0x30] sm:$0xff] %v1071_v30 }
 0x479   : > { %v1037_v63 = vpop.f32.mrf.mxu3 }
 0x47a   : > { %v1050_v62 = vmul.f32 %v1048_v36, %v1037_v63 }
 0x47c   : > { %v1066_v47 = vadd.f32 %v1058_v41, %v1050_v62 }
 0x47e   : > { %1074 = vst [vmem:[%s2247_s16 + $0x8] sm:$0xff] %v1066_v47 }
 0x481   : > { %v1039_v55 = vpop.f32.mrf.mxu3 }
 0x482   : > { %v1052_v17 = vmul.f32 %v1048_v36, %v1039_v55 }
 0x484   : > { %v1068_v15 = vadd.f32 %v1060_v23, %v1052_v17 }
 0x486   : > { %1076 = vst [vmem:[%s2247_s16 + $0x18] sm:$0xff] %v1068_v15 }
 0x489   : > { %v1042_v19 = vpop.f32.mrf.mxu3 }
 0x48a   : > { %v1054_v3 = vmul.f32 %v1048_v36, %v1042_v19 }
 0x48c   : > { %v1070_v21 = vadd.f32 %v1062_v10, %v1054_v3 }
 0x48e   : > { %1078 = vst [vmem:[%s2247_s16 + $0x28] sm:$0xff] %v1070_v21 }
 0x491   : > { %v1044_v46 = vpop.f32.mrf.mxu3 }
 0x492   : > { %v1056_v39 = vmul.f32 %v1048_v36, %v1044_v46 }
 0x494   : > { %v1072_v56 = vadd.f32 %v1064_v12, %v1056_v39 }
 0x496   : > { %1080 = vst [vmem:[%s2247_s16 + $0x38] sm:$0xff] %v1072_v56 }
 0x497   : > { %1606 = shalt.err (!%p1603_p0)
}
 0x498   : > { %s1671_s17 = smov 256   ;;  %s1672_s13 = smov 16  }
 0x499   : > { %1321 = dma.vmem_to_hbm [thread:$0]  (%p1757_p9), %s1097_s27, 1024, %s1099_s8, %s1082_s6, %s1671_s17, %s1671_s17, %s1672_s13  }
 0x49a PF: > { %s1113_s29 = sand.u32 1, %s1645_s20   ;;  %p1331_p1 = pnand %p1224_p12, %p1764_p11 }
 0x49b   : > { %s1114_s14 = scalar_lea.sflag [#allocation5], %s1113_s29 }
 0x49c   : > { %p1332_p2 = pneg %p1331_p1 }
 0x49e   : > { %1640 = dma.done.wait (%p1332_p2), %s1114_s14, 1024  }
 0x49f   : > { %1642 = vsyncadd (%p1332_p2), %s1114_s14, 4294966272  ;;  %s25_s25 = sadd.s32 1, %s1665_s25   ;;  %s2314_s15 = sld [smem:[#allocation13_spill]] }
 0x4a0   : > { %p22_p3 = scmp.ge.s32.totalorder %s25_s25, 4   ;;  %s2315_s7 = sld [smem:[#allocation12_spill]] }
 0x4a1   : > { %s2316_s20 = smov %s1649_s21  ;;  %s2317_s21 = smov %s1653_s22 }
 0x4a2   : > { %s2319_s23 = smov %s1661_s24  ;;  %24 = sbr.rel (!%p22_p3) target bundleno = 11 (0xb), region = 101 }
 0x4a5   : > { %s2318_s22 = smov %s2314_s15 }
 0x4a6   : > { %s2320_s24 = smov %s2315_s7 }
 0x4a7   :  { %1120 = vsyncpa [#allocation4], 1 }
 0x4a8   :  { %1122 = vsyncpa [#allocation4 + $0x1], 1 }
 0x4a9   :  { %1123 = vsyncpa [#allocation7], 1 }
 0x4aa   :  { %1125 = vsyncpa [#allocation7 + $0x1], 1 }
 0x4ab   :  { %1126 = vsyncpa [#allocation5], 1 }
 0x4ac   :  { %1128 = vsyncpa [#allocation5 + $0x1], 1 }

</bundles_post_ra>
